<compile_context>
chip_gen: v5e
topology: v5e:2x2
jax: 0.10.0
libtpu: 0.0.40
codegen_flags: <defaults>
</compile_context>

<pallas_src>
import jax
import jax.numpy as jnp
from jax.experimental import pallas as pl
from jax.experimental.pallas import tpu as pltpu

_TILE_ROWS = 256    # sublane-dim tile (multiple of 8)
_TILE_COLS = 1024   # lane-dim width  (multiple of 128)


def _powlog_scalar_q_kernel(q_ref, x_ref, o_ref):
    # q lives in SMEM as a (1,1) scalar; broadcast happens on the VPU for free.
    o_ref[...] = q_ref[0, 0] * jnp.log(x_ref[...])


def _powlog_tensor_q_kernel(x_ref, q_ref, o_ref):
    o_ref[...] = q_ref[...] * jnp.log(x_ref[...])


def _pad_to(v, m):
    return ((v + m - 1) // m) * m


def powlog(x, q):
    """z = log(x ** q), matching PowLogModel.forward semantics (x > 0)."""
    x = jnp.asarray(x, dtype=jnp.float32)
    q = jnp.asarray(q, dtype=jnp.float32)

    out_shape = jnp.broadcast_shapes(x.shape, q.shape)

    # Empty-input early exit (reshape tricks below assume n >= 1).
    n = 1
    for d in out_shape:
        n *= int(d)
    if n == 0:
        return jnp.zeros(out_shape, jnp.float32)

    scalar_q = (q.size == 1)

    # ---- choose a lane-dense, sublane-full 2-D slab layout -----------------
    cols = _TILE_COLS if n >= _TILE_COLS else 128
    rows = _pad_to(n, cols) // cols
    tile_rows = _TILE_ROWS if rows >= _TILE_ROWS else _pad_to(rows, 8)
    rows_padded = _pad_to(rows, tile_rows)
    total_padded = rows_padded * cols
    pad_amt = total_padded - n

    def _to_slab(arr):
        flat = jnp.broadcast_to(arr, out_shape).reshape(-1)
        if pad_amt:
            # pad with 1.0: log(1.0) = 0, keeps the padded lanes NaN-free
            flat = jnp.concatenate([flat, jnp.ones((pad_amt,), jnp.float32)])
        return flat.reshape(rows_padded, cols)

    x2 = _to_slab(x)
    grid = (rows_padded // tile_rows,)
    vmem_spec = pl.BlockSpec((tile_rows, cols), lambda i: (i, 0))
    cparams = pltpu.CompilerParams(dimension_semantics=("parallel",))
    out_sds = jax.ShapeDtypeStruct((rows_padded, cols), jnp.float32)

    if scalar_q:
        # q stays a scalar in SMEM — no broadcast materialized in HBM.
        q2 = q.reshape(1, 1)
        out2 = pl.pallas_call(
            _powlog_scalar_q_kernel,
            out_shape=out_sds,
            grid=grid,
            in_specs=[
                pl.BlockSpec((1, 1), lambda i: (0, 0),
                             memory_space=pltpu.MemorySpace.SMEM),
                vmem_spec,
            ],
            out_specs=vmem_spec,
            compiler_params=cparams,
        )(q2, x2)
    else:
        q2 = _to_slab(q)
        out2 = pl.pallas_call(
            _powlog_tensor_q_kernel,
            out_shape=out_sds,
            grid=grid,
            in_specs=[vmem_spec, vmem_spec],
            out_specs=vmem_spec,
            compiler_params=cparams,
        )(x2, q2)

    return out2.reshape(-1)[:n].reshape(out_shape)


if __name__ == "__main__":
    key = jax.random.PRNGKey(0)
    kx, kq = jax.random.split(key)

    # Case 1: the module example — scalar x = 5.0, q = 3.0
    x0 = jnp.float32(5.0)
    q0 = jnp.float32(3.0)
    z0 = powlog(x0, q0)
    jax.block_until_ready(z0)
    assert jnp.allclose(z0, jnp.log(x0 ** q0), rtol=1e-5, atol=1e-5), (z0,)

    # Case 2: tensor x with scalar q (fast path: q kept in SMEM)
    x1 = jax.random.uniform(kx, (2, 4, 16, 16), jnp.float32, 0.5, 4.0)
    q1 = jnp.float32(2.5)
    z1 = powlog(x1, q1)
    jax.block_until_ready(z1)
    assert z1.shape == (2, 4, 16, 16)
    assert jnp.allclose(z1, jnp.log(x1 ** q1), rtol=1e-5, atol=1e-5)

    # Case 3: tensor x and tensor q (streamed-q path)
    x2 = jax.random.uniform(kq, (8, 128), jnp.float32, 0.5, 4.0)
    q2 = jax.random.uniform(kx, (8, 128), jnp.float32, -2.0, 3.0)
    z2 = powlog(x2, q2)
    jax.block_until_ready(z2)
    assert jnp.allclose(z2, jnp.log(x2 ** q2), rtol=1e-5, atol=1e-5)

    print("KERNEL_OK")
</pallas_src>

<mosaic_0001>
module attributes {stable_mosaic.version = 11 : i64} {
  func.func @_powlog_scalar_q_kernel(%arg0: i32, %arg1: memref<1x1xf32, #tpu.memory_space<smem>>, %arg2: memref<8x128xf32, #tpu.memory_space<vmem>>, %arg3: memref<8x128xf32, #tpu.memory_space<vmem>>) attributes {dimension_semantics = [#tpu.dimension_semantics<parallel>], iteration_bounds = array<i64: 1>, scalar_prefetch = 0 : i64, scratch_operands = 0 : i64, tpu.core_type = #tpu.core_type<tc>, window_params = [{transform_indices = @transform_0, window_bounds = array<i64: 1, 1>}, {transform_indices = @transform_1, window_bounds = array<i64: 8, 128>}, {transform_indices = @transform_2, window_bounds = array<i64: 8, 128>}]} {
    %c0 = arith.constant 0 : index
    %c0_0 = arith.constant 0 : index
    %0 = memref.load %arg1[%c0, %c0_0] : memref<1x1xf32, #tpu.memory_space<smem>>
    %c0_1 = arith.constant 0 : index
    %c0_2 = arith.constant 0 : index
    %1 = vector.load %arg2[%c0_1, %c0_2] : memref<8x128xf32, #tpu.memory_space<vmem>>, vector<8x128xf32>
    %2 = math.log %1 : vector<8x128xf32>
    %3 = vector.broadcast %0 : f32 to vector<8x128xf32>
    %4 = arith.mulf %3, %2 : vector<8x128xf32>
    %c0_3 = arith.constant 0 : index
    %c0_4 = arith.constant 0 : index
    %5 = vector.load %arg3[%c0_3, %c0_4] : memref<8x128xf32, #tpu.memory_space<vmem>>, vector<8x128xf32>
    tpu.vector_store %arg3[%c0_3, %c0_4], %4 {strides = array<i32>} : memref<8x128xf32, #tpu.memory_space<vmem>>, vector<8x128xf32>,
    return
  }
  func.func @transform_0(%arg0: i32) -> (i32, i32) {
    %c0_i32 = arith.constant 0 : i32
    %c0_i32_0 = arith.constant 0 : i32
    %c0_i32_1 = arith.constant 0 : i32
    return %c0_i32, %c0_i32_0 : i32, i32
  }
  func.func @transform_1(%arg0: i32) -> (i32, i32) {
    %c0_i32 = arith.constant 0 : i32
    %c0_i32_0 = arith.constant 0 : i32
    return %arg0, %c0_i32 : i32, i32
  }
  func.func @transform_2(%arg0: i32) -> (i32, i32) {
    %c0_i32 = arith.constant 0 : i32
    %c0_i32_0 = arith.constant 0 : i32
    return %arg0, %c0_i32 : i32, i32
  }
}

</mosaic_0001>

<bundles_post_ra>
// kernel: tpu_custom_call.1
= control target key start
LH: loop header
LB: loop body
LE: loop exit
PB: predicated region body
PF: predicated region fallthrough
CT: control target
= control target key end

     0   :  { %8 = vsyncpa [#allocation4], 0  ;;  %s133_s0 = inlined_call_operand.<no memory space> [shape: f32[1,1], index: 0, kind: input, shape index: {}]   ;;  %s134_s1 = inlined_call_operand.hbm [shape: f32[8,128], index: 1, kind: input, shape index: {}]   ;;  %s135_s2 = inlined_call_operand.hbm [shape: f32[8,128], index: 2, kind: output, shape index: {}]  }
   0x1   :  { %9 = vsyncpa [#allocation5], 0  ;;  %s17_s11 = sshll.u32 %s134_s1, 4  ;;  %s107_s12 = smov [#allocation3]   ;;  %s18_s11 = int_to_ptr.hbm [resolvable:$true] %s17_s11 }
   0x2   :  { %s19_s13 = sshll.u32 %s107_s12, 4  ;;  %s20_s13 = int_to_ptr.vmem [resolvable:$true] %s19_s13 }
   0x3   :  { %22 = dma.hbm_to_vmem [thread:$0]  %s18_s11, 128, %s20_s13, [#allocation4]  }
   0x4   :  { %103 = dma.done.wait [#allocation4], 128  }
   0x5   :  { %104 = vsyncadd [#allocation4], 4294967168  ;;  %v28_v0 = vld [vmem:[#allocation3] sm:$0xff]  ;;  %v31_v2 = vstv %s133_s0  ;;  %s108_s16 = smov [#allocation6]   ;;  %s41_s1 = sshll.u32 %s135_s2, 4  ;;  %s42_s1 = int_to_ptr.hbm [resolvable:$true] %s41_s1 }
   0x6   :  { %53 = vlog2.f32 %v28_v0  ;;  %s39_s17 = sshll.u32 %s108_s16, 4  ;;  %s40_s17 = int_to_ptr.vmem [resolvable:$true] %s39_s17 }
   0xc   :  { %v54_v1 = vpop.eup %53 }
   0xd   :  { %v30_v3 = vmul.f32 0.6931472, %v54_v1 }
   0xf   :  { %v32_v4 = vmul.f32 %v31_v2, %v30_v3 }
  0x11   :  { %33 = vst [vmem:[#allocation6] sm:$0xff] %v32_v4 }
  0x12   :  { %44 = dma.vmem_to_hbm [thread:$0]  %s40_s17, 128, %s42_s1, [#allocation5]  }
  0x13   :  { %105 = dma.done.wait [#allocation5], 128  }
  0x14   :  { %106 = vsyncadd [#allocation5], 4294967168 }
  0x15   :  { %49 = vsyncpa [#allocation4], 1 }
  0x16   :  { %50 = vsyncpa [#allocation5], 1 }

</bundles_post_ra>
